<compile_context>
chip_gen: v6e
topology: v6e:2x2x1
jax: 0.10.0
libtpu: 0.0.40
codegen_flags: <defaults>
</compile_context>

<pallas_src>
import math

import jax
import jax.numpy as jnp
from jax.experimental import pallas as pl
from jax.experimental.pallas import tpu as pltpu


def make_positional_encoding(max_seq_len: int, d_model: int,
                             dtype=jnp.float32) -> jnp.ndarray:
    """Deterministic pe buffer, identical to the PyTorch __init__ construction.

    Cached directly in the model's activation dtype so the forward pass never
    pays an un-fused convert over the whole buffer.
    """
    position = jnp.arange(max_seq_len, dtype=jnp.float32)[:, None]          # (L, 1)
    div_term = jnp.exp(
        jnp.arange(0, d_model, 2, dtype=jnp.float32)
        * (-math.log(10000.0) / d_model)
    )                                                                        # (D/2,)
    angles = position * div_term                                             # (L, D/2)
    pe = jnp.zeros((max_seq_len, d_model), dtype=jnp.float32)
    pe = pe.at[:, 0::2].set(jnp.sin(angles))
    pe = pe.at[:, 1::2].set(jnp.cos(angles))
    return pe[None, :, :].astype(dtype)                                      # (1, L, D)


def _add_pe_kernel(x_ref, pe_ref, o_ref):
    # x_ref: (tb, tc), pe_ref: (1, tc) -> cheap sublane broadcast over batch.
    o_ref[...] = x_ref[...] + pe_ref[...]


def _round_up(n: int, m: int) -> int:
    return ((n + m - 1) // m) * m


def _round_down(n: int, m: int) -> int:
    return (n // m) * m


def positional_encoding_forward(x: jnp.ndarray, pe: jnp.ndarray,
                                donate_x: bool = False) -> jnp.ndarray:
    """x: (B, S, D), pe: (1, max_seq_len, D) -> x + pe[:, :S, :]."""
    B, S, D = x.shape
    _, L, Dp = pe.shape
    assert D == Dp, "d_model mismatch between x and pe"
    assert S <= L, "sequence length exceeds max_seq_len of the pe buffer"

    N = S * D
    if pe.dtype != x.dtype:
        # TODO(synk): PyTorch keeps pe in fp32 and type-promotes the add; this
        # downcast is a tiny precision difference for bf16/f16 activations.
        pe = pe.astype(x.dtype)

    itemsize = jnp.dtype(x.dtype).itemsize
    # Sub-32-bit dtypes pack along sublanes; pick the sublane multiple so
    # packed vregs are fully filled (unmasked stores, matters most on v5e).
    sub_mult = {4: 8, 2: 16, 1: 32}.get(itemsize, 8)

    # ---- byte-budget tile selection (~4 MiB x tile) -------------------------
    target_bytes = 4 * 1024 * 1024
    # Lane (last-dim) tile: multiple of 128 (lane-dense, unmasked vst), capped
    # so that even the minimum sublane count still fits the byte budget.
    tc_cap = max(128, _round_down(target_bytes // (sub_mult * itemsize), 128))
    tc = min(_round_up(N, 128), tc_cap)
    # Sublane (batch) tile: fill the remaining byte budget, multiple of
    # sub_mult, no bigger than the (rounded-up) batch.
    tb = _round_down(target_bytes // (tc * itemsize), sub_mult)
    tb = max(sub_mult, tb)
    tb = min(tb, _round_up(B, sub_mult))

    # Lane-dense layout: (B, S, D) -> (B, S*D) is a free, contiguous reshape.
    x2 = x.reshape(B, N)
    # Pass the FULL pe buffer flattened; the column index_map selects exactly
    # the lanes needed (flattened column c == s*D + d is identical for x and
    # pe since both are row-major over (S, D) / (L, D)).  No slice copy.
    pe2 = pe.reshape(1, L * D)

    # Grid order: lane-tile axis j OUTER, batch-tile axis i INNER, so pe's
    # block index (0, j) is constant across consecutive steps and its DMA is
    # skipped instead of re-issued B//tb times.
    grid = (pl.cdiv(N, tc), pl.cdiv(B, tb))

    tile_bytes = (2 * tb * tc + tc) * itemsize          # x + out + pe blocks
    vmem_limit = min(48 * 1024 * 1024,
                     max(32 * 1024 * 1024, 2 * tile_bytes + (2 << 20)))

    cost = pl.CostEstimate(
        flops=B * N,
        transcendentals=0,
        bytes_accessed=(2 * B * N + N) * itemsize,
    )

    out = pl.pallas_call(
        _add_pe_kernel,
        out_shape=jax.ShapeDtypeStruct((B, N), x.dtype),
        grid=grid,
        in_specs=[
            pl.BlockSpec((tb, tc), lambda j, i: (i, j)),
            pl.BlockSpec((1, tc), lambda j, i: (0, j)),
        ],
        out_specs=pl.BlockSpec((tb, tc), lambda j, i: (i, j)),
        compiler_params=pltpu.CompilerParams(
            dimension_semantics=("parallel", "parallel"),
            vmem_limit_bytes=vmem_limit,
        ),
        cost_estimate=cost,
        input_output_aliases={0: 0} if donate_x else {},
    )(x2, pe2)

    return out.reshape(B, S, D)


if __name__ == "__main__":
    max_seq_len = 16
    d_model = 32
    B, S = 2, 8

    key = jax.random.PRNGKey(0)
    x = jax.random.normal(key, (B, S, d_model), dtype=jnp.float32)

    pe = make_positional_encoding(max_seq_len, d_model, dtype=jnp.float32)

    out = positional_encoding_forward(x, pe)
    out = jax.block_until_ready(out)

    # Reference check against plain-JAX forward semantics.
    ref = x + pe[:, :S, :]
    assert out.shape == (B, S, d_model)
    assert jnp.allclose(out, ref, atol=1e-6), "mismatch vs reference"

    # Ragged-shape check (B and S*D not multiples of 8/128) to exercise the
    # cdiv grid + masked-edge path.
    key2 = jax.random.PRNGKey(1)
    x2 = jax.random.normal(key2, (3, 5, d_model), dtype=jnp.float32)
    out2 = jax.block_until_ready(positional_encoding_forward(x2, pe))
    ref2 = x2 + pe[:, :5, :]
    assert jnp.allclose(out2, ref2, atol=1e-6), "mismatch vs reference (ragged)"

    print("KERNEL_OK")
</pallas_src>

<mosaic_0001>
module attributes {stable_mosaic.version = 11 : i64} {
  func.func @_add_pe_kernel(%arg0: i32, %arg1: i32, %arg2: memref<8x256xf32, #tpu.memory_space<vmem>>, %arg3: memref<1x256xf32, #tpu.memory_space<vmem>>, %arg4: memref<8x256xf32, #tpu.memory_space<vmem>>) attributes {dimension_semantics = [#tpu.dimension_semantics<parallel>, #tpu.dimension_semantics<parallel>], iteration_bounds = array<i64: 1, 1>, scalar_prefetch = 0 : i64, scratch_operands = 0 : i64, tpu.core_type = #tpu.core_type<tc>, window_params = [{transform_indices = @transform_0, window_bounds = array<i64: 8, 256>}, {transform_indices = @transform_1, window_bounds = array<i64: 1, 256>}, {transform_indices = @transform_2, window_bounds = array<i64: 8, 256>}]} {
    %c0 = arith.constant 0 : index
    %c0_0 = arith.constant 0 : index
    %0 = vector.load %arg2[%c0, %c0_0] : memref<8x256xf32, #tpu.memory_space<vmem>>, vector<8x256xf32>
    %c0_1 = arith.constant 0 : index
    %c0_2 = arith.constant 0 : index
    %1 = vector.load %arg3[%c0_1, %c0_2] : memref<1x256xf32, #tpu.memory_space<vmem>>, vector<1x256xf32>
    %2 = vector.broadcast %1 : vector<1x256xf32> to vector<8x256xf32>
    %3 = arith.addf %0, %2 : vector<8x256xf32>
    %c0_3 = arith.constant 0 : index
    %c0_4 = arith.constant 0 : index
    %4 = vector.load %arg4[%c0_3, %c0_4] : memref<8x256xf32, #tpu.memory_space<vmem>>, vector<8x256xf32>
    tpu.vector_store %arg4[%c0_3, %c0_4], %3 {strides = array<i32>} : memref<8x256xf32, #tpu.memory_space<vmem>>, vector<8x256xf32>,
    return
  }
  func.func @transform_0(%arg0: i32, %arg1: i32) -> (i32, i32) {
    %c0_i32 = arith.constant 0 : i32
    return %arg1, %arg0 : i32, i32
  }
  func.func @transform_1(%arg0: i32, %arg1: i32) -> (i32, i32) {
    %c0_i32 = arith.constant 0 : i32
    %c0_i32_0 = arith.constant 0 : i32
    return %c0_i32, %arg0 : i32, i32
  }
  func.func @transform_2(%arg0: i32, %arg1: i32) -> (i32, i32) {
    %c0_i32 = arith.constant 0 : i32
    return %arg1, %arg0 : i32, i32
  }
}

</mosaic_0001>

<bundles_post_ra>
// kernel: tpu_custom_call.1
= control target key start
LH: loop header
LB: loop body
LE: loop exit
PB: predicated region body
PF: predicated region fallthrough
CT: control target
= control target key end

     0   :  { %7 = vsyncpa [#allocation3], 0  ;;  %s208_s0 = inlined_call_operand.hbm [shape: f32[2,256], index: 0, kind: input, shape index: {}]   ;;  %s209_s1 = inlined_call_operand.hbm [shape: f32[1,512], index: 1, kind: input, shape index: {}]   ;;  %s210_s2 = inlined_call_operand.hbm [shape: f32[2,256], index: 2, kind: output, shape index: {}]  }
   0x1   :  { %8 = vsyncpa [#allocation6], 0 }
   0x2   :  { %9 = vsyncpa [#allocation4], 0 }
   0x3   :  { %14 = vsyncadd [#allocation3], 192  ;;  %s172_s9 = smov [#allocation2]  }
   0x4   :  { %s15_s10 = sshll.u32 %s172_s9, 4  ;;  %s16_s10 = int_to_ptr.vmem [resolvable:$true] %s15_s10 }
   0x5   :  { %s114_s11 = scalar_lea.vmem %s16_s10, 64  ;;  %s118_s12 = scalar_lea.vmem %s16_s10, 256 }
   0x6   :  { %p115_p0 = scmp.ne.s32.totalorder %s16_s10, %s114_s11  ;;  %p119_p1 = scmp.lt.s32.totalorder %s16_s10, %s16_s10 }
   0x7   :  { %p120_p2 = scmp.lt.s32.totalorder %s118_s12, %s114_s11 }
   0x9   :  { %p121_p3 = por %p120_p2, %p119_p1 }
   0xb   :  { %p122_p4 = pnand %p121_p3, %p115_p0 }
   0xd   :  { %125 = shalt.err (!%p122_p4)
}
   0xe   :  { %s173_s13 = smov 64   ;;  %s174_s14 = smov 4  }
   0xf   :  { %21 = dma.hbm_to_vmem [thread:$0]  %s208_s0, 64, %s16_s10, [#allocation3], %s173_s13, %s173_s13, %s174_s14  }
  0x10   :  { %s175_s17 = smov [#allocation5]  }
  0x11   :  { %s28_s18 = sshll.u32 %s175_s17, 4  ;;  %s29_s18 = int_to_ptr.vmem [resolvable:$true] %s28_s18 }
  0x12   :  { %s134_s19 = scalar_lea.vmem %s29_s18, 32  ;;  %p139_p6 = scmp.lt.s32.totalorder %s29_s18, %s29_s18 }
  0x13   :  { %p135_p5 = scmp.ne.s32.totalorder %s29_s18, %s134_s19  ;;  %p140_p7 = scmp.lt.s32.totalorder %s134_s19, %s134_s19 }
  0x15   :  { %p141_p8 = por %p140_p7, %p139_p6 }
  0x17   :  { %p142_p9 = pnand %p141_p8, %p135_p5 }
  0x19   :  { %145 = shalt.err (!%p142_p9)
}
  0x1a   :  { %31 = dma.hbm_to_vmem [thread:$0]  %s209_s1, 32, %s29_s18, [#allocation6]  }
  0x1b   :  { %166 = dma.done.wait [#allocation3], 256  }
  0x1c   :  { %167 = vsyncadd [#allocation3], 4294967040 }
  0x1d   :  { %168 = dma.done.wait [#allocation6], 32  }
  0x1e   :  { %169 = vsyncadd [#allocation6], 4294967264  ;;  %v44_v0 = vlaneseq  ;;  %v176_v1 = vmov 1983009808   ;;  %v42_v7 = vld [vmem:[#allocation5] sm:$0x3] }
  0x1f   :  { %v55_v2 = vunpack.c.l.s4 %v176_v1  ;;  %v38_v13 = vld [vmem:[#allocation2] sm:$0xf]  ;;  %v40_v14 = vld [vmem:[#allocation2 + $0x8] sm:$0xf]  ;;  %v39_v17 = vld [vmem:[#allocation2 + $0x4] sm:$0xf] }
  0x20   :  { %v45_v3 = vshrl.u32 %v44_v0, 7  ;;  %v41_v18 = vld [vmem:[#allocation2 + $0xc] sm:$0xf] }
  0x21   :  { %v56_v6 = vunpack.c.0.s8 %v55_v2 }
  0x22   :  { %v46_v4 = vsub.s32 0, %v45_v3  ;;  %v50_v5 = vsub.s32 1, %v45_v3 }
  0x23   :  { %v59_v10 = vsub.s32 %v56_v6, %v45_v3 }
  0x24   :  { %v47_v8 = vrot.slane %v42_v7, %v46_v4  ;;  %v51_v9 = vrot.slane %v42_v7, %v50_v5 }
  0x26   :  { %v52_v11 = vcombine.low %v47_v8, %v51_v9  ;;  %v53_v12 = vcombine.high %v47_v8, %v51_v9 }
  0x28   :  { %v60_v15 = vrot.slane %v52_v11, %v59_v10  ;;  %v67_v16 = vrot.slane %v53_v12, %v59_v10 }
  0x2a   :  { %v74_v19 = vadd.f32 %v60_v15, %v38_v13  ;;  %v68_v20 = vcombine.high %v60_v15, %v60_v15  ;;  %v76_v21 = vadd.f32 %v67_v16, %v40_v14  ;;  %v69_v22 = vcombine.high %v67_v16, %v67_v16 }
  0x2c   :  { %78 = vst [vmem:[#allocation7] sm:$0xf] %v74_v19  ;;  %v75_v23 = vadd.f32 %v68_v20, %v39_v17  ;;  %80 = vst [vmem:[#allocation7 + $0x8] sm:$0xf] %v76_v21  ;;  %v77_v24 = vadd.f32 %v69_v22, %v41_v18 }
  0x2e   :  { %79 = vst [vmem:[#allocation7 + $0x4] sm:$0xf] %v75_v23  ;;  %81 = vst [vmem:[#allocation7 + $0xc] sm:$0xf] %v77_v24 }
  0x2f   :  { %86 = vsyncadd [#allocation4], 192  ;;  %s177_s0 = smov [#allocation7]  }
  0x30   :  { %s87_s1 = sshll.u32 %s177_s0, 4  ;;  %s88_s1 = int_to_ptr.vmem [resolvable:$true] %s87_s1 }
  0x31   :  { %s146_s22 = scalar_lea.vmem %s88_s1, 64  ;;  %s150_s23 = scalar_lea.vmem %s88_s1, 256 }
  0x32   :  { %p147_p10 = scmp.ne.s32.totalorder %s88_s1, %s146_s22  ;;  %p151_p11 = scmp.lt.s32.totalorder %s88_s1, %s88_s1 }
  0x33   :  { %p152_p12 = scmp.lt.s32.totalorder %s150_s23, %s146_s22 }
  0x35   :  { %p153_p13 = por %p152_p12, %p151_p11 }
  0x37   :  { %p154_p0 = pnand %p153_p13, %p147_p10 }
  0x39   :  { %157 = shalt.err (!%p154_p0)
}
  0x3a   :  { %93 = dma.vmem_to_hbm [thread:$0]  %s88_s1, 64, %s210_s2, [#allocation4], %s173_s13, %s173_s13, %s174_s14  }
  0x3b   :  { %170 = dma.done.wait [#allocation4], 256  }
  0x3c   :  { %171 = vsyncadd [#allocation4], 4294967040 }
  0x3d   :  { %97 = vsyncpa [#allocation3], 1 }
  0x3e   :  { %98 = vsyncpa [#allocation6], 1 }
  0x3f   :  { %99 = vsyncpa [#allocation4], 1 }

</bundles_post_ra>
